<compile_context>
chip_gen: v6e
topology: v6e:2x2x1
jax: 0.10.0
libtpu: 0.0.40
codegen_flags: <defaults>
</compile_context>

<pallas_src>
import jax
import jax.numpy as jnp
from jax.experimental import pallas as pl
from jax.experimental.pallas import tpu as pltpu


def _round_up(x, m):
    return ((x + m - 1) // m) * m


def fused_basicnet_kernel(ids_ref, iota_ref, t_ref, b1_ref, w2_ref, b2_ref, o_ref):
    """One batch tile of BasicNet, computed in transposed (feature, batch) layout.

    ids_ref  : (1, 2, TILE_B) int32   row 0 = user id, row 1 = numUser + adgroup id
    iota_ref : (V, TILE_B)    int32   row-index iota (VMEM-resident, loaded once)
    t_ref    : (F1, V)        f32     fc1 folded into both embedding tables
    b1_ref   : (F1, 1)        f32
    w2_ref   : (F1, 1)        f32
    b2_ref   : (1, 1)         f32     (SMEM scalar)
    o_ref    : (1, 1, TILE_B) f32     sigmoid output, batch on lanes
    """
    ids = ids_ref[0]                                   # (2, TILE_B)
    uid = ids[0:1]                                     # (1, TILE_B)
    aid = ids[1:2]                                     # (1, TILE_B), already offset

    # --- Two-hot gather+fc1 as a single exact 0/1 matmul (no XLA gather). ---
    # TODO(synk): out-of-range ids yield a zero contribution here, whereas
    # torch.nn.Embedding would raise an error.
    iota = iota_ref[...]                               # (V, TILE_B)
    two_hot = ((iota == uid) | (iota == aid)).astype(jnp.float32)   # (V, TILE_B)

    h = jnp.dot(t_ref[...], two_hot,
                preferred_element_type=jnp.float32) + b1_ref[...]   # (F1, TILE_B)
    h = jnp.maximum(h, 0.0)                                          # ReLU

    # --- fc2 (F1 -> 1): VPU multiply + sublane reduce; MXU skipped for N=1. ---
    logit = jnp.sum(h * w2_ref[...], axis=0, keepdims=True) + b2_ref[0, 0]
    o_ref[0] = jax.nn.sigmoid(logit).astype(o_ref.dtype)             # (1, TILE_B)


def basicnet_forward(user_ids, adgroup_ids, params, *, tile_b=4096):
    user_table = params["user_emb"]          # (numUser, Du)
    ad_table = params["adgroup_emb"]         # (numAdGroup, Da)
    w1 = params["w1"]                        # (Du+Da, F1)  == torch fc1.weight.T
    b1 = params["b1"]                        # (F1,)
    w2 = params["w2"]                        # (F1, 1)      == torch fc2.weight.T
    b2 = params["b2"]                        # (1,)

    n_user = user_table.shape[0]
    n_ad = ad_table.shape[0]
    du = user_table.shape[1]
    f1 = w1.shape[1]
    vocab = n_user + n_ad
    batch = user_ids.shape[0]

    # Lane-aligned batch tile; clamp so that large batches give >= 2 grid steps
    # (lets v7x shard the "parallel" axis across both TensorCores).
    half_batch = _round_up(pl.cdiv(batch, 2), 128)
    tile_b = max(128, min(_round_up(tile_b, 128), half_batch))
    b_pad = _round_up(batch, tile_b)
    num_tiles = b_pad // tile_b

    # ids -> (num_tiles, 2, TILE_B): row 0 user id, row 1 (numUser + adgroup id).
    # Pad rows use id 0 and are sliced off after the kernel.
    def prep_ids(ids, offset):
        flat = jnp.squeeze(ids, 1).astype(jnp.int32) + offset
        flat = jnp.pad(flat, (0, b_pad - batch))
        return flat.reshape(num_tiles, 1, tile_b)

    ids = jnp.concatenate(
        [prep_ids(user_ids, 0), prep_ids(adgroup_ids, n_user)], axis=1)

    # Fold fc1 into the embedding tables (tiny; done once per call at full
    # precision): T[:, :numUser] = w1_user.T @ user_table.T, etc.
    hi = jax.lax.Precision.HIGHEST
    t_user = jnp.dot(w1[:du].T, user_table.T, precision=hi)   # (F1, numUser)
    t_ad = jnp.dot(w1[du:].T, ad_table.T, precision=hi)       # (F1, numAdGroup)
    t_fold = jnp.concatenate([t_user, t_ad], axis=1)          # (F1, vocab)

    b1c = b1.reshape(f1, 1)
    w2c = w2.reshape(f1, 1)
    b2s = b2.reshape(1, 1)

    # Row-index iota, VMEM-resident across all grid steps (built once, no
    # per-step VPU iota regeneration inside the kernel).
    iota = jnp.broadcast_to(
        jnp.arange(vocab, dtype=jnp.int32)[:, None], (vocab, tile_b))

    def resident(shape):                     # VMEM-resident across all grid steps
        return pl.BlockSpec(shape, lambda i, _n=len(shape): (0,) * _n)

    ids_spec = pl.BlockSpec((1, 2, tile_b), lambda i: (i, 0, 0))
    out_spec = pl.BlockSpec((1, 1, tile_b), lambda i: (i, 0, 0))

    cost = pl.CostEstimate(
        flops=2 * f1 * vocab * b_pad + 2 * f1 * b_pad,
        transcendentals=b_pad,
        bytes_accessed=4 * (ids.size + iota.size + t_fold.size + 2 * f1 + 1 + b_pad),
    )

    out = pl.pallas_call(
        fused_basicnet_kernel,
        out_shape=jax.ShapeDtypeStruct((num_tiles, 1, tile_b), jnp.float32),
        grid=(num_tiles,),
        in_specs=[
            ids_spec,                                          # packed ids
            resident(iota.shape),                              # row-index iota
            resident(t_fold.shape),                            # folded fc1 table
            resident(b1c.shape),                               # b1
            resident(w2c.shape),                               # w2
            pl.BlockSpec(memory_space=pltpu.MemorySpace.SMEM), # b2 scalar
        ],
        out_specs=out_spec,
        compiler_params=pltpu.CompilerParams(
            dimension_semantics=("parallel",),
            vmem_limit_bytes=32 * 1024 * 1024),
        cost_estimate=cost,
    )(ids, iota, t_fold, b1c, w2c, b2s)

    # Lane-dense slab -> (B, 1)
    return out.reshape(b_pad, 1)[:batch]


if __name__ == "__main__":
    # Config (small, consistent with the module's __init__)
    numUser, numAdGroup = 100, 50
    dimUserEmb, dimAdGroupEmb, dimFc1 = 16, 16, 32
    batch = 8

    key = jax.random.PRNGKey(0)
    ks = jax.random.split(key, 8)

    params = {
        "user_emb": jax.random.normal(ks[0], (numUser, dimUserEmb), jnp.float32),
        "adgroup_emb": jax.random.normal(ks[1], (numAdGroup, dimAdGroupEmb), jnp.float32),
        "w1": jax.random.normal(ks[2], (dimUserEmb + dimAdGroupEmb, dimFc1), jnp.float32) * 0.1,
        "b1": jax.random.normal(ks[3], (dimFc1,), jnp.float32) * 0.01,
        "w2": jax.random.normal(ks[4], (dimFc1, 1), jnp.float32) * 0.1,
        "b2": jax.random.normal(ks[5], (1,), jnp.float32) * 0.01,
    }

    # batchSample.userIds / adGroupIds are (B, 1) integer id tensors.
    user_ids = jax.random.randint(ks[6], (batch, 1), 0, numUser)
    adgroup_ids = jax.random.randint(ks[7], (batch, 1), 0, numAdGroup)

    # TODO(synk): self.criterion (nn.BCELoss) is unused in forward(); not implemented.
    out = jax.block_until_ready(basicnet_forward(user_ids, adgroup_ids, params))
    assert out.shape == (batch, 1) and out.dtype == jnp.float32

    # Pure-JAX reference (same math as the PyTorch forward()).
    ue = jnp.take(params["user_emb"], jnp.squeeze(user_ids, 1), axis=0)
    ae = jnp.take(params["adgroup_emb"], jnp.squeeze(adgroup_ids, 1), axis=0)
    cat = jnp.concatenate([ue, ae], axis=1)
    hidden = jnp.maximum(
        jnp.dot(cat, params["w1"], precision=jax.lax.Precision.HIGHEST) + params["b1"], 0.0)
    ref = jax.nn.sigmoid(
        jnp.dot(hidden, params["w2"], precision=jax.lax.Precision.HIGHEST) + params["b2"])
    max_err = float(jnp.max(jnp.abs(out - ref)))
    assert max_err < 5e-3, f"mismatch vs reference, max_err={max_err}"
    assert bool(jnp.all((out >= 0.0) & (out <= 1.0)))
    print("KERNEL_OK")
</pallas_src>

<mosaic_0001>
module attributes {stable_mosaic.version = 11 : i64} {
  func.func @fused_basicnet_kernel(%arg0: i32, %arg1: memref<1x2x128xi32, #tpu.memory_space<vmem>>, %arg2: memref<150x128xi32, #tpu.memory_space<vmem>>, %arg3: memref<32x150xf32, #tpu.memory_space<vmem>>, %arg4: memref<32x1xf32, #tpu.memory_space<vmem>>, %arg5: memref<32x1xf32, #tpu.memory_space<vmem>>, %arg6: memref<1x1xf32, #tpu.memory_space<smem>>, %arg7: memref<1x1x128xf32, #tpu.memory_space<vmem>>) attributes {dimension_semantics = [#tpu.dimension_semantics<parallel>], iteration_bounds = array<i64: 1>, scalar_prefetch = 0 : i64, scratch_operands = 0 : i64, tpu.core_type = #tpu.core_type<tc>, window_params = [{transform_indices = @transform_0, window_bounds = array<i64: 1, 2, 128>}, {pipeline_mode = #tpu.pipeline_mode<synchronous>, transform_indices = @transform_1, window_bounds = array<i64: 150, 128>}, {pipeline_mode = #tpu.pipeline_mode<synchronous>, transform_indices = @transform_2, window_bounds = array<i64: 32, 150>}, {pipeline_mode = #tpu.pipeline_mode<synchronous>, transform_indices = @transform_3, window_bounds = array<i64: 32, 1>}, {pipeline_mode = #tpu.pipeline_mode<synchronous>, transform_indices = @transform_4, window_bounds = array<i64: 32, 1>}, {transform_indices = @transform_5, window_bounds = array<i64: 1, 1>}, {transform_indices = @transform_6, window_bounds = array<i64: 1, 1, 128>}]} {
    %c0 = arith.constant 0 : index
    %c0_0 = arith.constant 0 : index
    %c0_1 = arith.constant 0 : index
    %0 = vector.load %arg1[%c0, %c0_0, %c0_1] : memref<1x2x128xi32, #tpu.memory_space<vmem>>, vector<1x2x128xi32>
    %1 = vector.shape_cast %0 : vector<1x2x128xi32> to vector<2x128xi32>
    %2 = vector.extract_strided_slice %1 {offsets = [0, 0], sizes = [1, 128], strides = [1, 1]} : vector<2x128xi32> to vector<1x128xi32>
    %3 = vector.extract_strided_slice %1 {offsets = [1, 0], sizes = [1, 128], strides = [1, 1]} : vector<2x128xi32> to vector<1x128xi32>
    %c0_2 = arith.constant 0 : index
    %c0_3 = arith.constant 0 : index
    %4 = vector.load %arg2[%c0_2, %c0_3] : memref<150x128xi32, #tpu.memory_space<vmem>>, vector<150x128xi32>
    %5 = vector.broadcast %2 : vector<1x128xi32> to vector<150x128xi32>
    %6 = arith.cmpi eq, %4, %5 : vector<150x128xi32>
    %7 = vector.broadcast %3 : vector<1x128xi32> to vector<150x128xi32>
    %8 = arith.cmpi eq, %4, %7 : vector<150x128xi32>
    %9 = arith.ori %6, %8 : vector<150x128xi1>
    %10 = arith.extui %9 : vector<150x128xi1> to vector<150x128xi32>
    %11 = arith.sitofp %10 : vector<150x128xi32> to vector<150x128xf32>
    %c0_4 = arith.constant 0 : index
    %c0_5 = arith.constant 0 : index
    %12 = vector.load %arg3[%c0_4, %c0_5] : memref<32x150xf32, #tpu.memory_space<vmem>>, vector<32x150xf32>
    %cst = arith.constant dense<0.000000e+00> : vector<32x128xf32>
    %13 = tpu.matmul %12, %11, %cst {dimension_numbers = #tpu.dot_dimension_numbers<[1], [0], [0], [1], [0, 0, 1, 1], [], []>} : vector<32x150xf32>, vector<150x128xf32>, vector<32x128xf32> -> vector<32x128xf32>
    %c0_6 = arith.constant 0 : index
    %c0_7 = arith.constant 0 : index
    %14 = vector.load %arg4[%c0_6, %c0_7] : memref<32x1xf32, #tpu.memory_space<vmem>>, vector<32x1xf32>
    %15 = vector.broadcast %14 : vector<32x1xf32> to vector<32x128xf32>
    %16 = arith.addf %13, %15 : vector<32x128xf32>
    %cst_8 = arith.constant 0.000000e+00 : f32
    %17 = vector.broadcast %cst_8 : f32 to vector<32x128xf32>
    %18 = arith.maximumf %16, %17 : vector<32x128xf32>
    %c0_9 = arith.constant 0 : index
    %c0_10 = arith.constant 0 : index
    %19 = vector.load %arg5[%c0_9, %c0_10] : memref<32x1xf32, #tpu.memory_space<vmem>>, vector<32x1xf32>
    %20 = vector.broadcast %19 : vector<32x1xf32> to vector<32x128xf32>
    %21 = arith.mulf %18, %20 : vector<32x128xf32>
    %cst_11 = arith.constant dense<0.000000e+00> : vector<128xf32>
    %22 = vector.multi_reduction <add>, %21, %cst_11 [0] : vector<32x128xf32> to vector<128xf32>
    %23 = vector.shape_cast %22 : vector<128xf32> to vector<1x128xf32>
    %c0_12 = arith.constant 0 : index
    %c0_13 = arith.constant 0 : index
    %24 = memref.load %arg6[%c0_12, %c0_13] : memref<1x1xf32, #tpu.memory_space<smem>>
    %25 = vector.broadcast %24 : f32 to vector<1x128xf32>
    %26 = arith.addf %23, %25 : vector<1x128xf32>
    %27 = arith.negf %26 : vector<1x128xf32>
    %28 = math.exp %27 : vector<1x128xf32>
    %cst_14 = arith.constant 1.000000e+00 : f32
    %29 = vector.broadcast %cst_14 : f32 to vector<1x128xf32>
    %30 = arith.addf %29, %28 : vector<1x128xf32>
    %31 = arith.divf %29, %30 : vector<1x128xf32>
    %c0_15 = arith.constant 0 : index
    %c0_16 = arith.constant 0 : index
    %c0_17 = arith.constant 0 : index
    %32 = vector.load %arg7[%c0_15, %c0_16, %c0_17] : memref<1x1x128xf32, #tpu.memory_space<vmem>>, vector<1x1x128xf32>
    %33 = vector.shape_cast %32 : vector<1x1x128xf32> to vector<1x128xf32>
    %34 = vector.shape_cast %31 : vector<1x128xf32> to vector<1x1x128xf32>
    tpu.vector_store %arg7[%c0_15, %c0_16, %c0_17], %34 {strides = array<i32>} : memref<1x1x128xf32, #tpu.memory_space<vmem>>, vector<1x1x128xf32>,
    return
  }
  func.func @transform_0(%arg0: i32) -> (i32, i32, i32) {
    %c0_i32 = arith.constant 0 : i32
    %c0_i32_0 = arith.constant 0 : i32
    %c0_i32_1 = arith.constant 0 : i32
    return %arg0, %c0_i32, %c0_i32_0 : i32, i32, i32
  }
  func.func @transform_1(%arg0: i32) -> (i32, i32) {
    %c0_i32 = arith.constant 0 : i32
    %c0_i32_0 = arith.constant 0 : i32
    %c0_i32_1 = arith.constant 0 : i32
    return %c0_i32, %c0_i32_0 : i32, i32
  }
  func.func @transform_2(%arg0: i32) -> (i32, i32) {
    %c0_i32 = arith.constant 0 : i32
    %c0_i32_0 = arith.constant 0 : i32
    %c0_i32_1 = arith.constant 0 : i32
    return %c0_i32, %c0_i32_0 : i32, i32
  }
  func.func @transform_3(%arg0: i32) -> (i32, i32) {
    %c0_i32 = arith.constant 0 : i32
    %c0_i32_0 = arith.constant 0 : i32
    %c0_i32_1 = arith.constant 0 : i32
    return %c0_i32, %c0_i32_0 : i32, i32
  }
  func.func @transform_4(%arg0: i32) -> (i32, i32) {
    %c0_i32 = arith.constant 0 : i32
    %c0_i32_0 = arith.constant 0 : i32
    %c0_i32_1 = arith.constant 0 : i32
    return %c0_i32, %c0_i32_0 : i32, i32
  }
  func.func @transform_5(%arg0: i32) -> (i32, i32) {
    %c0_i32 = arith.constant 0 : i32
    %c0_i32_0 = arith.constant 0 : i32
    %c0_i32_1 = arith.constant 0 : i32
    return %c0_i32, %c0_i32_0 : i32, i32
  }
  func.func @transform_6(%arg0: i32) -> (i32, i32, i32) {
    %c0_i32 = arith.constant 0 : i32
    %c0_i32_0 = arith.constant 0 : i32
    %c0_i32_1 = arith.constant 0 : i32
    return %arg0, %c0_i32, %c0_i32_0 : i32, i32, i32
  }
}

</mosaic_0001>

<bundles_post_ra>
// kernel: tpu_custom_call.1
= control target key start
LH: loop header
LB: loop body
LE: loop exit
PB: predicated region body
PF: predicated region fallthrough
CT: control target
= control target key end

     0   :  { %12 = vsyncpa [#allocation4], 0  ;;  %s723_s0 = inlined_call_operand.vmem [shape: s32[1,2,128], index: 0, kind: input, shape index: {}]   ;;  %s724_s1 = inlined_call_operand.hbm [shape: s32[150,128], index: 1, kind: input, shape index: {}]   ;;  %s725_s2 = inlined_call_operand.vmem [shape: f32[32,150], index: 2, kind: input, shape index: {}]   ;;  %s726_s3 = inlined_call_operand.vmem [shape: f32[32,1], index: 3, kind: input, shape index: {}]   ;;  %s727_s4 = inlined_call_operand.vmem [shape: f32[32,1], index: 4, kind: input, shape index: {}]   ;;  %s728_s5 = inlined_call_operand.<no memory space> [shape: f32[1,1], index: 5, kind: input, shape index: {}]   ;;  %s729_s6 = inlined_call_operand.hbm [shape: f32[1,1,128], index: 6, kind: output, shape index: {}]  }
   0x1   :  { %13 = vsyncpa [#allocation5], 0  ;;  %s500_s21 = smov [#allocation3]  }
   0x2   :  { %s21_s22 = sshll.u32 %s500_s21, 4  ;;  %s22_s22 = int_to_ptr.vmem [resolvable:$true] %s21_s22 }
   0x3   :  { %s464_s23 = scalar_lea.vmem %s22_s22, 2432  ;;  %p469_p1 = scmp.lt.s32.totalorder %s22_s22, %s22_s22 }
   0x4   :  { %p465_p0 = scmp.ne.s32.totalorder %s22_s22, %s464_s23  ;;  %p470_p2 = scmp.lt.s32.totalorder %s464_s23, %s464_s23 }
   0x6   :  { %p471_p3 = por %p470_p2, %p469_p1 }
   0x8   :  { %p472_p4 = pnand %p471_p3, %p465_p0 }
   0xa   :  { %475 = shalt.err (!%p472_p4)
}
   0xb   :  { %s501_s24 = smov 128   ;;  %s502_s25 = smov 8  }
   0xc   :  { %27 = dma.hbm_to_vmem [thread:$0]  %s724_s1, 2432, %s22_s22, [#allocation4], %s501_s24, %s501_s24, %s502_s25  }
   0xd   :  { %496 = dma.done.wait [#allocation4], 2432  }
   0xe   :  { %497 = vsyncadd [#allocation4], 4294964864  ;;  %v59_v0 = vlaneseq  ;;  %v503_v1 = vmov 0.0   ;;  %v504_v3 = vmov 0   ;;  %v39_v6 = vld [vmem:[%s723_s0] sm:$0x3] }
   0xf   :  { %211 = vmatprep.subr.mxu0 %v503_v1  ;;  %405 = vmatprep.subr.mxu1 %v503_v1  ;;  %v55_v7 = vld [vmem:[#allocation3 + $0x78] sm:$0xff]  ;;  %v54_v8 = vld [vmem:[#allocation3 + $0x70] sm:$0xff]  ;;  %v53_v11 = vld [vmem:[#allocation3 + $0x68] sm:$0xff]  ;;  %v505_v14 = vmov 1.0   ;;  %s506_s9 = smov [#allocation6]  }
  0x10   :  { %v60_v2 = vshrl.u32 %v59_v0, 7  ;;  %450 = vset.pattern.permute.xlu0 %v504_v3  ;;  %451 = vset.pattern.permute.xlu1 %v504_v3  ;;  %v52_v12 = vld [vmem:[#allocation3 + $0x60] sm:$0xff]  ;;  %v51_v13 = vld [vmem:[#allocation3 + $0x58] sm:$0xff]  ;;  %v50_v15 = vld [vmem:[#allocation3 + $0x50] sm:$0xff]  ;;  %s353_s10 = sshll.u32 %s506_s9, 4  ;;  %s354_s10 = int_to_ptr.vmem [resolvable:$true] %s353_s10 }
  0x11   :  { %v49_v16 = vld [vmem:[#allocation3 + $0x48] sm:$0xff]  ;;  %v48_v17 = vld [vmem:[#allocation3 + $0x40] sm:$0xff]  ;;  %v47_v18 = vld [vmem:[#allocation3 + $0x38] sm:$0xff]  ;;  %s476_s11 = scalar_lea.vmem %s354_s10, 16  ;;  %s480_s12 = scalar_lea.vmem %s354_s10, 32 }
  0x12   :  { %v61_v4 = vsub.s32 0, %v60_v2  ;;  %v84_v5 = vsub.s32 1, %v60_v2  ;;  %v46_v19 = vld [vmem:[#allocation3 + $0x30] sm:$0xff]  ;;  %v45_v20 = vld [vmem:[#allocation3 + $0x28] sm:$0xff]  ;;  %v44_v21 = vld [vmem:[#allocation3 + $0x20] sm:$0xff]  ;;  %p477_p5 = scmp.ne.s32.totalorder %s354_s10, %s476_s11  ;;  %p481_p6 = scmp.lt.s32.totalorder %s354_s10, %s354_s10 }
  0x13   :  { %v43_v22 = vld [vmem:[#allocation3 + $0x18] sm:$0xff]  ;;  %v42_v23 = vld [vmem:[#allocation3 + $0x10] sm:$0xff]  ;;  %v41_v24 = vld [vmem:[#allocation3 + $0x8] sm:$0xff]  ;;  %p482_p7 = scmp.lt.s32.totalorder %s480_s12, %s476_s11 }
  0x14   :  { %v550_v9 = vrot.slane %v39_v6, %v61_v4  ;;  %v552_v10 = vrot.slane %v39_v6, %v84_v5  ;;  %v58_v25 = vld [vmem:[#allocation3 + $0x90] sm:$0x3f]  ;;  %v40_v26 = vld [vmem:[#allocation3] sm:$0xff]  ;;  %v57_v27 = vld [vmem:[#allocation3 + $0x88] sm:$0xff] }
  0x15   :  { %v56_v28 = vld [vmem:[#allocation3 + $0x80] sm:$0xff]  ;;  %v163_v30 = vld [vmem:[%s725_s2 + $0x8] sm:$0xff]  ;;  %v165_v34 = vld [vmem:[%s725_s2 + $0x18] sm:$0xff]  ;;  %p483_p8 = por %p482_p7, %p481_p6 }
  0x16   :  { %vm78_vm0 = vcmp.eq.s32.totalorder %v55_v7, %v550_v9  ;;  %vm101_vm1 = vcmp.eq.s32.totalorder %v55_v7, %v552_v10  ;;  %vm77_vm2 = vcmp.eq.s32.totalorder %v54_v8, %v550_v9  ;;  %vm100_vm3 = vcmp.eq.s32.totalorder %v54_v8, %v552_v10  ;;  %v167_v31 = vld [vmem:[%s725_s2 + $0x28] sm:$0xff]  ;;  %v162_v32 = vld [vmem:[%s725_s2] sm:$0xff]  ;;  %v169_v35 = vld [vmem:[%s725_s2 + $0x38] sm:$0xff] }
  0x17   :  { %vm120_vm4 = vmor %vm78_vm0, %vm101_vm1  ;;  %vm76_vm5 = vcmp.eq.s32.totalorder %v53_v11, %v550_v9  ;;  %vm99_vm6 = vcmp.eq.s32.totalorder %v53_v11, %v552_v10  ;;  %vm75_vm8 = vcmp.eq.s32.totalorder %v52_v12, %v550_v9  ;;  %vm98_vm9 = vcmp.eq.s32.totalorder %v52_v12, %v552_v10  ;;  %v166_v33 = vld [vmem:[%s725_s2 + $0x20] sm:$0xff]  ;;  %v172_v37 = vld [vmem:[%s726_s3 + $0x10] sm:$0xff]  ;;  %p484_p9 = pnand %p483_p8, %p477_p5 }
  0x18   :  { %381 = vmatpush1.msk.msra.mxu0 %vm120_vm4, %v505_v14  ;;  %424 = vmatpush1.msk.msra.mxu1 %vm120_vm4, %v505_v14  ;;  %vm119_vm7 = vmor %vm77_vm2, %vm100_vm3  ;;  %vm74_vm11 = vcmp.eq.s32.totalorder %v51_v13, %v550_v9  ;;  %vm97_vm12 = vcmp.eq.s32.totalorder %v51_v13, %v552_v10  ;;  %vm73_vm14 = vcmp.eq.s32.totalorder %v50_v15, %v550_v9  ;;  %v170_v36 = vld [vmem:[%s726_s3] sm:$0xff]  ;;  %v164_v38 = vld [vmem:[%s725_s2 + $0x10] sm:$0xff] }
  0x19   :  { %213 = vmatprep.subr.mxu0 %v503_v1  ;;  %406 = vmatprep.subr.mxu1 %v503_v1  ;;  %vm118_vm10 = vmor %vm76_vm5, %vm99_vm6  ;;  %vm96_vm15 = vcmp.eq.s32.totalorder %v50_v15, %v552_v10  ;;  %vm72_vm1 = vcmp.eq.s32.totalorder %v49_v16, %v550_v9  ;;  %vm95_vm2 = vcmp.eq.s32.totalorder %v49_v16, %v552_v10  ;;  %v168_v39 = vld [vmem:[%s725_s2 + $0x30] sm:$0xff]  ;;  %v171_v40 = vld [vmem:[%s726_s3 + $0x8] sm:$0xff] }
  0x1a   :  { %382 = vmatpush1.msk.msra.mxu0 %vm119_vm7, %v505_v14  ;;  %425 = vmatpush1.msk.msra.mxu1 %vm119_vm7, %v505_v14  ;;  %vm117_vm13 = vmor %vm75_vm8, %vm98_vm9  ;;  %vm71_vm4 = vcmp.eq.s32.totalorder %v48_v17, %v550_v9  ;;  %vm94_vm5 = vcmp.eq.s32.totalorder %v48_v17, %v552_v10  ;;  %vm70_vm7 = vcmp.eq.s32.totalorder %v47_v18, %v550_v9  ;;  %v173_v41 = vld [vmem:[%s726_s3 + $0x18] sm:$0xff]  ;;  %v300_v42 = vld [vmem:[%s727_s4] sm:$0xff] }
  0x1b   :  { %215 = vmatprep.subr.mxu0 %v503_v1  ;;  %407 = vmatprep.subr.mxu1 %v503_v1  ;;  %vm116_vm0 = vmor %vm74_vm11, %vm97_vm12  ;;  %vm93_vm8 = vcmp.eq.s32.totalorder %v47_v18, %v552_v10  ;;  %vm92_vm11 = vcmp.eq.s32.totalorder %v46_v19, %v552_v10  ;;  %v301_v43 = vld [vmem:[%s727_s4 + $0x8] sm:$0xff]  ;;  %v302_v44 = vld [vmem:[%s727_s4 + $0x10] sm:$0xff]  ;;  %v338_v18 = vstv %s728_s5 }
  0x1c   :  { %383 = vmatpush1.msk.msra.mxu0 %vm118_vm10, %v505_v14  ;;  %426 = vmatpush1.msk.msra.mxu1 %vm118_vm10, %v505_v14  ;;  %vm115_vm3 = vmor %vm73_vm14, %vm96_vm15  ;;  %vm69_vm10 = vcmp.eq.s32.totalorder %v46_v19, %v550_v9  ;;  %vm91_vm14 = vcmp.eq.s32.totalorder %v45_v20, %v552_v10  ;;  %v303_v45 = vld [vmem:[%s727_s4 + $0x18] sm:$0xff] }
  0x1d   :  { %217 = vmatprep.subr.mxu0 %v503_v1  ;;  %408 = vmatprep.subr.mxu1 %v503_v1  ;;  %vm114_vm6 = vmor %vm72_vm1, %vm95_vm2  ;;  %vm90_vm1 = vcmp.eq.s32.totalorder %v44_v21, %v552_v10 }
  0x1e   :  { %384 = vmatpush1.msk.msra.mxu0 %vm117_vm13, %v505_v14  ;;  %427 = vmatpush1.msk.msra.mxu1 %vm117_vm13, %v505_v14  ;;  %vm113_vm9 = vmor %vm71_vm4, %vm94_vm5  ;;  %vm68_vm13 = vcmp.eq.s32.totalorder %v45_v20, %v550_v9  ;;  %vm89_vm4 = vcmp.eq.s32.totalorder %v43_v22, %v552_v10 }
  0x1f   :  { %219 = vmatprep.subr.mxu0 %v503_v1  ;;  %409 = vmatprep.subr.mxu1 %v503_v1  ;;  %vm112_vm12 = vmor %vm70_vm7, %vm93_vm8  ;;  %vm88_vm7 = vcmp.eq.s32.totalorder %v42_v23, %v552_v10 }
  0x20   :  { %385 = vmatpush1.msk.msra.mxu0 %vm116_vm0, %v505_v14  ;;  %428 = vmatpush1.msk.msra.mxu1 %vm116_vm0, %v505_v14  ;;  %vm111_vm15 = vmor %vm69_vm10, %vm92_vm11  ;;  %vm67_vm0 = vcmp.eq.s32.totalorder %v44_v21, %v550_v9  ;;  %vm87_vm10 = vcmp.eq.s32.totalorder %v41_v24, %v552_v10 }
  0x21   :  { %221 = vmatprep.subr.mxu0 %v503_v1  ;;  %410 = vmatprep.subr.mxu1 %v503_v1  ;;  %vm110_vm2 = vmor %vm68_vm13, %vm91_vm14  ;;  %vm104_vm13 = vcmp.eq.s32.totalorder %v58_v25, %v552_v10  ;;  %vm63_vm14 = vcmp.eq.s32.totalorder %v40_v26, %v550_v9 }
  0x22   :  { %386 = vmatpush1.msk.msra.mxu0 %vm115_vm3, %v505_v14  ;;  %429 = vmatpush1.msk.msra.mxu1 %vm115_vm3, %v505_v14  ;;  %vm66_vm3 = vcmp.eq.s32.totalorder %v43_v22, %v550_v9  ;;  %vm109_vm5 = vmor %vm67_vm0, %vm90_vm1 }
  0x23   :  { %223 = vmatprep.subr.mxu0 %v503_v1  ;;  %411 = vmatprep.subr.mxu1 %v503_v1  ;;  %vm108_vm8 = vmor %vm66_vm3, %vm89_vm4  ;;  %vm80_vm3 = vcmp.eq.s32.totalorder %v57_v27, %v550_v9  ;;  %vm103_vm4 = vcmp.eq.s32.totalorder %v57_v27, %v552_v10 }
  0x24   :  { %387 = vmatpush1.msk.msra.mxu0 %vm114_vm6, %v505_v14  ;;  %430 = vmatpush1.msk.msra.mxu1 %vm114_vm6, %v505_v14  ;;  %vm65_vm6 = vcmp.eq.s32.totalorder %v42_v23, %v550_v9 }
  0x25   :  { %225 = vmatprep.subr.mxu0 %v503_v1  ;;  %412 = vmatprep.subr.mxu1 %v503_v1  ;;  %vm107_vm11 = vmor %vm65_vm6, %vm88_vm7  ;;  %vm79_vm6 = vcmp.eq.s32.totalorder %v56_v28, %v550_v9  ;;  %vm102_vm7 = vcmp.eq.s32.totalorder %v56_v28, %v552_v10 }
  0x26   :  { %388 = vmatpush1.msk.msra.mxu0 %vm113_vm9, %v505_v14  ;;  %431 = vmatpush1.msk.msra.mxu1 %vm113_vm9, %v505_v14  ;;  %vm64_vm9 = vcmp.eq.s32.totalorder %v41_v24, %v550_v9 }
  0x27   :  { %227 = vmatprep.subr.mxu0 %v503_v1  ;;  %413 = vmatprep.subr.mxu1 %v503_v1  ;;  %vm106_vm0 = vmor %vm64_vm9, %vm87_vm10  ;;  %vm194_vm10 = vcmask 179200  }
  0x28   :  { %389 = vmatpush1.msk.msra.mxu0 %vm112_vm12, %v505_v14  ;;  %432 = vmatpush1.msk.msra.mxu1 %vm112_vm12, %v505_v14  ;;  %vm81_vm12 = vcmp.eq.s32.totalorder %v58_v25, %v550_v9  ;;  %vm121_vm9 = vmor %vm79_vm6, %vm102_vm7 }
  0x29   :  { %229 = vmatprep.subr.mxu0 %v503_v1  ;;  %414 = vmatprep.subr.mxu1 %v503_v1  ;;  %vm123_vm1 = vmor %vm81_vm12, %vm104_vm13 }
  0x2a   :  { %390 = vmatpush1.msk.msra.mxu0 %vm111_vm15, %v505_v14  ;;  %433 = vmatpush1.msk.msra.mxu1 %vm111_vm15, %v505_v14  ;;  %vm86_vm15 = vcmp.eq.s32.totalorder %v40_v26, %v552_v10  ;;  %v380_v29 = vsel %vm123_vm1, 1.0, %v503_v1 }
  0x2b   :  { %231 = vmatprep.subr.mxu0 %v503_v1  ;;  %415 = vmatprep.subr.mxu1 %v503_v1 }
  0x2c   :  { %391 = vmatpush1.msk.msra.mxu0 %vm110_vm2, %v505_v14  ;;  %434 = vmatpush1.msk.msra.mxu1 %vm110_vm2, %v505_v14  ;;  %vm105_vm2 = vmor %vm63_vm14, %vm86_vm15 }
  0x2d   :  { %233 = vmatprep.subr.mxu0 %v503_v1  ;;  %416 = vmatprep.subr.mxu1 %v503_v1 }
  0x2e   :  { %392 = vmatpush1.msk.msra.mxu0 %vm109_vm5, %v505_v14  ;;  %435 = vmatpush1.msk.msra.mxu1 %vm109_vm5, %v505_v14  ;;  %vm207_vm5 = vcmask 1045504  }
  0x2f   :  { %235 = vmatprep.subr.mxu0 %v503_v1  ;;  %417 = vmatprep.subr.mxu1 %v503_v1 }
  0x30   :  { %393 = vmatpush1.msk.msra.mxu0 %vm108_vm8, %v505_v14  ;;  %436 = vmatpush1.msk.msra.mxu1 %vm108_vm8, %v505_v14  ;;  %vm122_vm8 = vmor %vm80_vm3, %vm103_vm4 }
  0x31   :  { %237 = vmatprep.subr.mxu0 %v503_v1  ;;  %418 = vmatprep.subr.mxu1 %v503_v1 }
  0x32   :  { %394 = vmatpush1.msk.msra.mxu0 %vm107_vm11, %v505_v14  ;;  %437 = vmatpush1.msk.msra.mxu1 %vm107_vm11, %v505_v14 }
  0x33   :  { %239 = vmatprep.subr.mxu0 %v503_v1  ;;  %419 = vmatprep.subr.mxu1 %v503_v1 }
  0x34   :  { %395 = vmatpush1.msk.msra.mxu0 %vm106_vm0, %v505_v14  ;;  %438 = vmatpush1.msk.msra.mxu1 %vm106_vm0, %v505_v14 }
  0x35   :  { %241 = vmatprep.subr.mxu0 %v503_v1  ;;  %420 = vmatprep.subr.mxu1 %v503_v1 }
  0x36   :  { %396 = vmatpush1.msk.msra.mxu0 %vm105_vm2, %v505_v14  ;;  %439 = vmatpush1.msk.msra.mxu1 %vm105_vm2, %v505_v14 }
  0x37   :  { %269 = vmatprep.subr.mxu0 %v503_v1  ;;  %421 = vmatprep.subr.mxu1 %v503_v1 }
  0x38   :  { %397 = vmatpush2.msk.msra.mxu0 %vm207_vm5, %v380_v29  ;;  %440 = vmatpush2.msk.msra.mxu1 %vm207_vm5, %v380_v29 }
  0x39   :  { %271 = vmatprep.subr.mxu0 %v503_v1  ;;  %422 = vmatprep.subr.mxu1 %v503_v1 }
  0x3a   :  { %398 = vmatpush2.msk.msra.mxu0 %vm122_vm8, %v505_v14  ;;  %441 = vmatpush2.msk.msra.mxu1 %vm122_vm8, %v505_v14 }
  0x3b   :  { %273 = vmatprep.subr.mxu0 %v503_v1  ;;  %423 = vmatprep.subr.mxu1 %v503_v1 }
  0x3c   :  { %399 = vmatpush2.msk.msra.mxu0 %vm121_vm9, %v505_v14  ;;  %442 = vmatpush2.msk.msra.mxu1 %vm121_vm9, %v505_v14 }
  0x3d   :  { %400 = vmatprep.mubr.msk.f32.mxu0 %vm194_vm10, %v163_v30  ;;  %402 = vmatprep.mubr.msk.f32.mxu1 %vm194_vm10, %v167_v31 }
  0x3e   :  { %276 = vmatmul.mubr.f32.vlgmr.msra.gmra.mxu0 %v162_v32  ;;  %286 = vmatmul.mubr.f32.vlgmr.msra.gmra.mxu1 %v166_v33 }
  0x3f   :  { %401 = vmatprep.mubr.msk.f32.mxu0 %vm194_vm10, %v165_v34  ;;  %403 = vmatprep.mubr.msk.f32.mxu1 %vm194_vm10, %v169_v35 }
  0x40   :  { %176 = vperm.xlu0 %450, %v170_v36   ;;  %186 = vperm.xlu1 %451, %v172_v37  }
  0x42   :  { %281 = vmatmul.mubr.f32.gmra.mxu0 %v164_v38  ;;  %291 = vmatmul.mubr.f32.gmra.mxu1 %v168_v39 }
  0x44   :  { %181 = vperm.xlu0 %450, %v171_v40   ;;  %191 = vperm.xlu1 %451, %v173_v41  }
  0x48   :  { %306 = vperm.xlu0 %450, %v300_v42   ;;  %311 = vperm.xlu1 %451, %v301_v43  }
  0x4c   :  { %316 = vperm.xlu0 %450, %v302_v44   ;;  %321 = vperm.xlu1 %451, %v303_v45  }
  0xbb   :  { %v177_v46 = vpop.permute.xlu0 %176  ;;  %v187_v47 = vpop.permute.xlu1 %186 }
  0xbf   :  { %v182_v48 = vpop.permute.xlu0 %181  ;;  %v192_v49 = vpop.permute.xlu1 %191 }
  0xc3   :  { %v307_v55 = vpop.permute.xlu0 %306  ;;  %v312_v59 = vpop.permute.xlu1 %311 }
  0xc7   :  { %v317_v6 = vpop.permute.xlu0 %316  ;;  %v322_v9 = vpop.permute.xlu1 %321 }
  0xfe   :  { %v277_v50 = vpop.f32.mrf.mxu0  ;;  %v287_v51 = vpop.f32.mrf.mxu1 }
  0xff   :  { %v278_v52 = vadd.f32 %v277_v50, %v177_v46  ;;  %v288_v56 = vadd.f32 %v287_v51, %v187_v47 }
 0x100   :  { %v279_v53 = vpop.f32.mrf.mxu0  ;;  %v289_v54 = vpop.f32.mrf.mxu1 }
 0x101   :  { %v296_v60 = vmax.f32 %v278_v52, 0.0  ;;  %v298_v1 = vmax.f32 %v288_v56, 0.0 }
 0x102   :  { %v282_v57 = vpop.f32.mrf.mxu0  ;;  %v292_v58 = vpop.f32.mrf.mxu1 }
 0x103   :  { %v283_v61 = vadd.f32 %v282_v57, %v182_v48  ;;  %v293_v62 = vadd.f32 %v292_v58, %v192_v49  ;;  %v324_v3 = vmul.f32 %v307_v55, %v296_v60  ;;  %v326_v7 = vmul.f32 %v317_v6, %v298_v1 }
 0x104   :  { %v284_v63 = vpop.f32.mrf.mxu0  ;;  %v294_v0 = vpop.f32.mrf.mxu1 }
 0x105   :  { %v297_v2 = vmax.f32 %v283_v61, 0.0  ;;  %v299_v5 = vmax.f32 %v293_v62, 0.0 }
 0x107   :  { %v325_v4 = vmul.f32 %v312_v59, %v297_v2  ;;  %v327_v10 = vmul.f32 %v322_v9, %v299_v5 }
 0x109   :  { %v328_v8 = vadd.f32 %v325_v4, %v324_v3 }
 0x10b   :  { %v329_v11 = vadd.f32 %v328_v8, %v326_v7 }
 0x10d   :  { %v330_v12 = vadd.f32 %v329_v11, %v327_v10 }
 0x10f   :  { %v331_v13 = vrot.slane %v330_v12, 4 }
 0x111   :  { %v332_v14 = vadd.f32 %v331_v13, %v330_v12 }
 0x113   :  { %v333_v15 = vrot.slane %v332_v14, 2 }
 0x115   :  { %v334_v16 = vadd.f32 %v333_v15, %v332_v14 }
 0x117   :  { %v335_v17 = vrot.slane %v334_v16, 1 }
 0x119   :  { %v336_v19 = vadd.f32 %v335_v17, %v334_v16 }
 0x11b   :  { %v339_v20 = vadd.f32 %v338_v18, %v336_v19 }
 0x11d   :  { %v404_v21 = vmul.f32 -1.442695, %v339_v20 }
 0x11f   :  { %452 = vpow2.f32 %v404_v21 }
 0x12c   :  { %v453_v22 = vpop.eup %452 }
 0x12d   :  { %v343_v23 = vadd.f32 1.0, %v453_v22 }
 0x12f   :  { %454 = vrcp.f32 %v343_v23 }
 0x13c   :  { %v455_v24 = vpop.eup %454 }
 0x13d   :  { %346 = vst [vmem:[#allocation6] sm:$0x1] %v455_v24 }
 0x13e   :  { %487 = shalt.err (!%p484_p9)
}
 0x13f   :  { %356 = dma.vmem_to_hbm [thread:$0]  %s354_s10, 16, %s729_s6, [#allocation5]  }
 0x140   :  { %498 = dma.done.wait [#allocation5], 16  }
 0x141   :  { %499 = vsyncadd [#allocation5], 4294967280 }
 0x142   :  { %360 = vsyncpa [#allocation4], 1 }
 0x143   :  { %361 = vsyncpa [#allocation5], 1 }

</bundles_post_ra>
